<compile_context>
chip_gen: v7x
topology: tpu7x:2x2x1
jax: 0.10.0
libtpu: 0.0.40
codegen_flags: <defaults>
</compile_context>

<pallas_src>
import functools

import jax
import jax.numpy as jnp
from jax import lax
from jax.experimental import pallas as pl
from jax.experimental.pallas import tpu as pltpu  # noqa: F401  (TPU backend)

_LANE = 128
_SUBLANE = 8


def _round_up(x, m):
    return (x + m - 1) // m * m


def _fused_encoder_kernel(x_ref, w_ref, p_ref, o_ref, *,
                          num_layers, batch, eps, slope):
    """Fused [Linear -> BatchNorm1d(train) -> LeakyReLU] * num_layers.

    x_ref: (Bpad, Dpad) f32   padded input activations
    w_ref: (L, Dpad, Dpad)    padded transposed weights ([in, out] layout)
    p_ref: (L, 3, Dpad)       packed [bias; gamma; beta] per layer
    o_ref: (Bpad, Dpad)       padded output of the last layer
    """
    inv_n = 1.0 / batch
    y = x_ref[...]                                   # (Bpad, Dpad) f32
    b_pad = y.shape[0]

    if b_pad != batch:
        # Padded batch rows must not pollute the batch statistics.
        row_ids = lax.broadcasted_iota(jnp.int32, (b_pad, 1), 0)
        row_mask = (row_ids < batch).astype(jnp.float32)
    else:
        row_mask = None

    for l in range(num_layers):                      # static unroll (L is tiny)
        # Linear: y @ W^T + b   (MXU, f32 accumulation; W pre-transposed)
        y = jnp.dot(y, w_ref[l], preferred_element_type=jnp.float32)
        p = p_ref[l]                                 # (3, Dpad): bias/gamma/beta
        y = y + p[0:1, :]

        # BatchNorm1d (training mode), single-pass biased batch statistics.
        if row_mask is None:
            s = jnp.sum(y, axis=0, keepdims=True)
            sq = jnp.sum(y * y, axis=0, keepdims=True)
        else:
            ym = y * row_mask
            s = jnp.sum(ym, axis=0, keepdims=True)
            sq = jnp.sum(ym * y, axis=0, keepdims=True)
        mean = s * inv_n
        var = jnp.maximum(sq * inv_n - mean * mean, 0.0)
        z = (y - mean) * lax.rsqrt(var + eps) * p[1:2, :] + p[2:3, :]

        # LeakyReLU
        y = jnp.where(z >= 0, z, slope * z)

    o_ref[...] = y.astype(o_ref.dtype)


def init_encoder_params(key, input_dim, encode_dims):
    """Deterministic synthetic init (stands in for `model_init`)."""
    dims = [input_dim] + list(encode_dims)
    params = []
    for i in range(len(dims) - 1):
        din, dout = dims[i], dims[i + 1]
        key, kw, kb, kg, kbe = jax.random.split(key, 5)
        params.append(dict(
            weight=jax.random.normal(kw, (dout, din), jnp.float32) * 0.1,
            bias=jax.random.normal(kb, (dout,), jnp.float32) * 0.1,
            gamma=1.0 + 0.1 * jax.random.normal(kg, (dout,), jnp.float32),
            beta=0.1 * jax.random.normal(kbe, (dout,), jnp.float32),
        ))
    return params


def prepare_encoder_params(params, input_dim, encode_dims):
    """One-time packing: transpose weights, pad to lane-dense 128, pack b/g/beta."""
    dims = [input_dim] + list(encode_dims)
    d_pad = _round_up(max(dims), _LANE)
    w_stack, p_stack = [], []
    for i, p in enumerate(params):
        din, dout = dims[i], dims[i + 1]
        wt = jnp.zeros((d_pad, d_pad), jnp.float32).at[:din, :dout].set(p["weight"].T)
        pk = jnp.zeros((3, d_pad), jnp.float32)
        pk = pk.at[0, :dout].set(p["bias"])
        pk = pk.at[1, :dout].set(p["gamma"])
        pk = pk.at[2, :dout].set(p["beta"])
        w_stack.append(wt)
        p_stack.append(pk)
    return jnp.stack(w_stack), jnp.stack(p_stack), d_pad


def make_encoder_forward(w_stack, p_stack, input_dim, out_dim,
                         *, eps=1e-5, slope=0.01):
    """Returns a jitted forward: x (B, input_dim) -> (B, out_dim)."""
    num_layers, d_pad, _ = w_stack.shape

    def forward(x):
        batch = x.shape[0]
        b_pad = _round_up(max(batch, _SUBLANE), _SUBLANE)
        x_pad = jnp.zeros((b_pad, d_pad), jnp.float32).at[:batch, :input_dim].set(x)

        kernel = functools.partial(
            _fused_encoder_kernel,
            num_layers=num_layers, batch=batch, eps=eps, slope=slope)

        full = lambda shape: pl.BlockSpec(shape, lambda: (0,) * len(shape))
        out_pad = pl.pallas_call(
            kernel,
            out_shape=jax.ShapeDtypeStruct((b_pad, d_pad), jnp.float32),
            in_specs=[
                full((b_pad, d_pad)),              # activations
                full((num_layers, d_pad, d_pad)),  # stacked weights
                full((num_layers, 3, d_pad)),      # packed bias/gamma/beta
            ],
            out_specs=full((b_pad, d_pad)),
        )(x_pad, w_stack, p_stack)
        return out_pad[:batch, :out_dim]

    return jax.jit(forward)


if __name__ == "__main__":
    # Small shapes consistent with the module: batch=8, input_dim=32, encode_dims=[64, 16]
    B, input_dim = 8, 32
    encode_dims = [64, 16]

    key = jax.random.PRNGKey(0)
    kx, kp = jax.random.split(key)
    x = jax.random.normal(kx, (B, input_dim), jnp.float32)
    params = init_encoder_params(kp, input_dim, encode_dims)

    w_stack, p_stack, _ = prepare_encoder_params(params, input_dim, encode_dims)
    encoder_forward = make_encoder_forward(w_stack, p_stack, input_dim, encode_dims[-1])

    out = encoder_forward(x)
    out = jax.block_until_ready(out)

    # Pure-JAX reference (training-mode batch norm, leaky relu slope 0.01).
    def ref(x, params):
        for p in params:
            y = x @ p["weight"].T + p["bias"]
            m = jnp.mean(y, axis=0, keepdims=True)
            v = jnp.mean((y - m) ** 2, axis=0, keepdims=True)
            z = (y - m) / jnp.sqrt(v + 1e-5) * p["gamma"] + p["beta"]
            x = jnp.where(z >= 0, z, 0.01 * z)
        return x

    ref_out = ref(x, params)
    assert out.shape == (B, encode_dims[-1])
    assert jnp.allclose(out, ref_out, atol=1e-4, rtol=1e-4), "mismatch vs reference"
    print("KERNEL_OK")
</pallas_src>

<mosaic_0001>
module attributes {stable_mosaic.version = 11 : i64} {
  func.func @_fused_encoder_kernel(%arg0: memref<8x128xf32, #tpu.memory_space<vmem>>, %arg1: memref<2x128x128xf32, #tpu.memory_space<vmem>>, %arg2: memref<2x3x128xf32, #tpu.memory_space<vmem>>, %arg3: memref<8x128xf32, #tpu.memory_space<vmem>>) attributes {dimension_semantics = [], scalar_prefetch = 0 : i64, scratch_operands = 0 : i64, tpu.core_type = #tpu.core_type<tc>} {
    %c0 = arith.constant 0 : index
    %c0_0 = arith.constant 0 : index
    %0 = vector.load %arg0[%c0, %c0_0] : memref<8x128xf32, #tpu.memory_space<vmem>>, vector<8x128xf32>
    %c0_1 = arith.constant 0 : index
    %c0_2 = arith.constant 0 : index
    %c0_3 = arith.constant 0 : index
    %1 = vector.load %arg1[%c0_1, %c0_2, %c0_3] : memref<2x128x128xf32, #tpu.memory_space<vmem>>, vector<1x128x128xf32>
    %2 = vector.shape_cast %1 : vector<1x128x128xf32> to vector<128x128xf32>
    %cst = arith.constant dense<0.000000e+00> : vector<8x128xf32>
    %3 = tpu.matmul %0, %2, %cst {dimension_numbers = #tpu.dot_dimension_numbers<[1], [0], [0], [1], [0, 0, 1, 1], [], []>} : vector<8x128xf32>, vector<128x128xf32>, vector<8x128xf32> -> vector<8x128xf32>
    %c0_4 = arith.constant 0 : index
    %c0_5 = arith.constant 0 : index
    %c0_6 = arith.constant 0 : index
    %4 = vector.load %arg2[%c0_4, %c0_5, %c0_6] : memref<2x3x128xf32, #tpu.memory_space<vmem>>, vector<1x3x128xf32>
    %5 = vector.shape_cast %4 : vector<1x3x128xf32> to vector<3x128xf32>
    %6 = vector.extract_strided_slice %5 {offsets = [0, 0], sizes = [1, 128], strides = [1, 1]} : vector<3x128xf32> to vector<1x128xf32>
    %7 = vector.broadcast %6 : vector<1x128xf32> to vector<8x128xf32>
    %8 = arith.addf %3, %7 : vector<8x128xf32>
    %cst_7 = arith.constant dense<0.000000e+00> : vector<128xf32>
    %9 = vector.multi_reduction <add>, %8, %cst_7 [0] : vector<8x128xf32> to vector<128xf32>
    %10 = vector.shape_cast %9 : vector<128xf32> to vector<1x128xf32>
    %11 = arith.mulf %8, %8 : vector<8x128xf32>
    %cst_8 = arith.constant dense<0.000000e+00> : vector<128xf32>
    %12 = vector.multi_reduction <add>, %11, %cst_8 [0] : vector<8x128xf32> to vector<128xf32>
    %13 = vector.shape_cast %12 : vector<128xf32> to vector<1x128xf32>
    %cst_9 = arith.constant 1.250000e-01 : f32
    %14 = vector.broadcast %cst_9 : f32 to vector<1x128xf32>
    %15 = arith.mulf %10, %14 : vector<1x128xf32>
    %cst_10 = arith.constant 1.250000e-01 : f32
    %16 = vector.broadcast %cst_10 : f32 to vector<1x128xf32>
    %17 = arith.mulf %13, %16 : vector<1x128xf32>
    %18 = arith.mulf %15, %15 : vector<1x128xf32>
    %19 = arith.subf %17, %18 : vector<1x128xf32>
    %cst_11 = arith.constant 0.000000e+00 : f32
    %20 = vector.broadcast %cst_11 : f32 to vector<1x128xf32>
    %21 = arith.maximumf %19, %20 : vector<1x128xf32>
    %22 = vector.broadcast %15 : vector<1x128xf32> to vector<8x128xf32>
    %23 = arith.subf %8, %22 : vector<8x128xf32>
    %cst_12 = arith.constant 9.99999974E-6 : f32
    %24 = vector.broadcast %cst_12 : f32 to vector<1x128xf32>
    %25 = arith.addf %21, %24 : vector<1x128xf32>
    %26 = math.rsqrt %25 : vector<1x128xf32>
    %27 = vector.broadcast %26 : vector<1x128xf32> to vector<8x128xf32>
    %28 = arith.mulf %23, %27 : vector<8x128xf32>
    %29 = vector.extract_strided_slice %5 {offsets = [1, 0], sizes = [1, 128], strides = [1, 1]} : vector<3x128xf32> to vector<1x128xf32>
    %30 = vector.broadcast %29 : vector<1x128xf32> to vector<8x128xf32>
    %31 = arith.mulf %28, %30 : vector<8x128xf32>
    %32 = vector.extract_strided_slice %5 {offsets = [2, 0], sizes = [1, 128], strides = [1, 1]} : vector<3x128xf32> to vector<1x128xf32>
    %33 = vector.broadcast %32 : vector<1x128xf32> to vector<8x128xf32>
    %34 = arith.addf %31, %33 : vector<8x128xf32>
    %cst_13 = arith.constant 0.000000e+00 : f32
    %35 = vector.broadcast %cst_13 : f32 to vector<8x128xf32>
    %36 = arith.cmpf oge, %34, %35 : vector<8x128xf32>
    %cst_14 = arith.constant 0.00999999977 : f32
    %37 = vector.broadcast %cst_14 : f32 to vector<8x128xf32>
    %38 = arith.mulf %37, %34 : vector<8x128xf32>
    %39 = arith.select %36, %34, %38 : vector<8x128xi1>, vector<8x128xf32>
    %c1 = arith.constant 1 : index
    %c0_15 = arith.constant 0 : index
    %c0_16 = arith.constant 0 : index
    %40 = vector.load %arg1[%c1, %c0_15, %c0_16] : memref<2x128x128xf32, #tpu.memory_space<vmem>>, vector<1x128x128xf32>
    %41 = vector.shape_cast %40 : vector<1x128x128xf32> to vector<128x128xf32>
    %cst_17 = arith.constant dense<0.000000e+00> : vector<8x128xf32>
    %42 = tpu.matmul %39, %41, %cst_17 {dimension_numbers = #tpu.dot_dimension_numbers<[1], [0], [0], [1], [0, 0, 1, 1], [], []>} : vector<8x128xf32>, vector<128x128xf32>, vector<8x128xf32> -> vector<8x128xf32>
    %c1_18 = arith.constant 1 : index
    %c0_19 = arith.constant 0 : index
    %c0_20 = arith.constant 0 : index
    %43 = vector.load %arg2[%c1_18, %c0_19, %c0_20] : memref<2x3x128xf32, #tpu.memory_space<vmem>>, vector<1x3x128xf32>
    %44 = vector.shape_cast %43 : vector<1x3x128xf32> to vector<3x128xf32>
    %45 = vector.extract_strided_slice %44 {offsets = [0, 0], sizes = [1, 128], strides = [1, 1]} : vector<3x128xf32> to vector<1x128xf32>
    %46 = vector.broadcast %45 : vector<1x128xf32> to vector<8x128xf32>
    %47 = arith.addf %42, %46 : vector<8x128xf32>
    %cst_21 = arith.constant dense<0.000000e+00> : vector<128xf32>
    %48 = vector.multi_reduction <add>, %47, %cst_21 [0] : vector<8x128xf32> to vector<128xf32>
    %49 = vector.shape_cast %48 : vector<128xf32> to vector<1x128xf32>
    %50 = arith.mulf %47, %47 : vector<8x128xf32>
    %cst_22 = arith.constant dense<0.000000e+00> : vector<128xf32>
    %51 = vector.multi_reduction <add>, %50, %cst_22 [0] : vector<8x128xf32> to vector<128xf32>
    %52 = vector.shape_cast %51 : vector<128xf32> to vector<1x128xf32>
    %cst_23 = arith.constant 1.250000e-01 : f32
    %53 = vector.broadcast %cst_23 : f32 to vector<1x128xf32>
    %54 = arith.mulf %49, %53 : vector<1x128xf32>
    %cst_24 = arith.constant 1.250000e-01 : f32
    %55 = vector.broadcast %cst_24 : f32 to vector<1x128xf32>
    %56 = arith.mulf %52, %55 : vector<1x128xf32>
    %57 = arith.mulf %54, %54 : vector<1x128xf32>
    %58 = arith.subf %56, %57 : vector<1x128xf32>
    %cst_25 = arith.constant 0.000000e+00 : f32
    %59 = vector.broadcast %cst_25 : f32 to vector<1x128xf32>
    %60 = arith.maximumf %58, %59 : vector<1x128xf32>
    %61 = vector.broadcast %54 : vector<1x128xf32> to vector<8x128xf32>
    %62 = arith.subf %47, %61 : vector<8x128xf32>
    %cst_26 = arith.constant 9.99999974E-6 : f32
    %63 = vector.broadcast %cst_26 : f32 to vector<1x128xf32>
    %64 = arith.addf %60, %63 : vector<1x128xf32>
    %65 = math.rsqrt %64 : vector<1x128xf32>
    %66 = vector.broadcast %65 : vector<1x128xf32> to vector<8x128xf32>
    %67 = arith.mulf %62, %66 : vector<8x128xf32>
    %68 = vector.extract_strided_slice %44 {offsets = [1, 0], sizes = [1, 128], strides = [1, 1]} : vector<3x128xf32> to vector<1x128xf32>
    %69 = vector.broadcast %68 : vector<1x128xf32> to vector<8x128xf32>
    %70 = arith.mulf %67, %69 : vector<8x128xf32>
    %71 = vector.extract_strided_slice %44 {offsets = [2, 0], sizes = [1, 128], strides = [1, 1]} : vector<3x128xf32> to vector<1x128xf32>
    %72 = vector.broadcast %71 : vector<1x128xf32> to vector<8x128xf32>
    %73 = arith.addf %70, %72 : vector<8x128xf32>
    %cst_27 = arith.constant 0.000000e+00 : f32
    %74 = vector.broadcast %cst_27 : f32 to vector<8x128xf32>
    %75 = arith.cmpf oge, %73, %74 : vector<8x128xf32>
    %cst_28 = arith.constant 0.00999999977 : f32
    %76 = vector.broadcast %cst_28 : f32 to vector<8x128xf32>
    %77 = arith.mulf %76, %73 : vector<8x128xf32>
    %78 = arith.select %75, %73, %77 : vector<8x128xi1>, vector<8x128xf32>
    %c0_29 = arith.constant 0 : index
    %c0_30 = arith.constant 0 : index
    %79 = vector.load %arg3[%c0_29, %c0_30] : memref<8x128xf32, #tpu.memory_space<vmem>>, vector<8x128xf32>
    tpu.vector_store %arg3[%c0_29, %c0_30], %78 {strides = array<i32>} : memref<8x128xf32, #tpu.memory_space<vmem>>, vector<8x128xf32>,
    return
  }
}

</mosaic_0001>

<bundles_post_ra>
// kernel: forward.1
= control target key start
LH: loop header
LB: loop body
LE: loop exit
PB: predicated region body
PF: predicated region fallthrough
CT: control target
= control target key end

     0   :  { %8 = vsyncpa [#allocation3], 0  ;;  %s593_s0 = inlined_call_operand.vmem [shape: f32[8,128], index: 0, kind: input, shape index: {}]   ;;  %s594_s1 = inlined_call_operand.hbm [shape: f32[2,128,128], index: 1, kind: input, shape index: {}]   ;;  %s595_s2 = inlined_call_operand.vmem [shape: f32[2,3,128], index: 2, kind: input, shape index: {}]   ;;  %s596_s3 = inlined_call_operand.hbm [shape: f32[8,128], index: 3, kind: output, shape index: {}]  }
   0x1   :  { %9 = vsyncpa [#allocation4], 0  ;;  %s512_s12 = smov [#allocation2]   ;;  %s464_s16 = scalar_lea.hbm %s594_s1, 4096 }
   0x2   :  { %s17_s13 = sshll.u32 %s512_s12, 4  ;;  %p465_p0 = scmp.ne.s32.totalorder %s594_s1, %s464_s16  ;;  %s18_s13 = int_to_ptr.vmem [resolvable:$true] %s17_s13 }
   0x3   :  { %p468_p1 = scmp.lt.u32.totalorder %s464_s16, %s594_s1 }
   0x5   :  { %p470_p2 = pnand %p468_p1, %p465_p0 }
   0x7   :  { %473 = shalt.err (!%p470_p2)
}
   0x8   :  { %s474_s21 = scalar_lea.vmem %s18_s13, 4096  ;;  %p479_p4 = scmp.lt.s32.totalorder %s18_s13, %s18_s13 }
   0x9   :  { %p475_p3 = scmp.ne.s32.totalorder %s18_s13, %s474_s21  ;;  %p480_p5 = scmp.lt.s32.totalorder %s474_s21, %s474_s21 }
   0xb   :  { %p481_p6 = por %p480_p5, %p479_p4 }
   0xd   :  { %p482_p7 = pnand %p481_p6, %p475_p3 }
   0xf   :  { %485 = shalt.err (!%p482_p7)
}
  0x10   :  { %s513_s22 = smov 128   ;;  %s514_s23 = smov 8  }
  0x11   :  { %23 = dma.hbm_to_vmem [thread:$0]  %s594_s1, 4096, %s18_s13, [#allocation3], %s513_s22, %s513_s22, %s514_s23  }
  0x12   :  { %508 = dma.done.wait [#allocation3], 4096  }
  0x13   :  { %509 = vsyncadd [#allocation3], 4294963200  ;;  %v515_v0 = vmov 0.0|0.0   ;;  %vm516_vm0 = vmmov 0   ;;  %v517_v1 = vmov 0.0   ;;  %v30_v2 = vld [vmem:[#allocation2] sm:$0xff]  ;;  %v47_v51 = vlaneseq }
  0x14   :  { %405 = vmatprep.subr.bf16.mxu0 %v515_v0  ;;  %367 = vmatprep.mubr.msk.f32.mxu0 %vm516_vm0, %v517_v1  ;;  %v31_v3 = vld [vmem:[#allocation2 + $0x8] sm:$0xff]  ;;  %v32_v4 = vld [vmem:[#allocation2 + $0x10] sm:$0xff]  ;;  %v33_v6 = vld [vmem:[#allocation2 + $0x18] sm:$0xff] }
  0x15   :  { %429 = vmatprep.subr.bf16.mxu1 %v515_v0  ;;  %402 = vmatprep.mubr.msk.f32.mxu1 %vm516_vm0, %v517_v1  ;;  %v406_v5 = vpack.c.bf16 %v31_v3, %v30_v2  ;;  %v409_v7 = vpack.c.bf16 %v33_v6, %v32_v4  ;;  %v34_v8 = vld [vmem:[#allocation2 + $0x20] sm:$0xff]  ;;  %v35_v9 = vld [vmem:[#allocation2 + $0x28] sm:$0xff]  ;;  %v36_v11 = vld [vmem:[#allocation2 + $0x30] sm:$0xff]  ;;  %v570_v52 = vshrl.u32 %v47_v51, 7 }
  0x16   :  { %v412_v10 = vpack.c.bf16 %v35_v9, %v34_v8  ;;  %v37_v12 = vld [vmem:[#allocation2 + $0x38] sm:$0xff]  ;;  %v38_v14 = vld [vmem:[#allocation2 + $0x40] sm:$0xff]  ;;  %v39_v15 = vld [vmem:[#allocation2 + $0x48] sm:$0xff] }
  0x17   :  { %407 = vmatpush3.bf16.msra.mxu0 %v406_v5  ;;  %v415_v13 = vpack.c.bf16 %v37_v12, %v36_v11  ;;  %v418_v16 = vpack.c.bf16 %v39_v15, %v38_v14  ;;  %v40_v17 = vld [vmem:[#allocation2 + $0x50] sm:$0xff]  ;;  %v41_v18 = vld [vmem:[#allocation2 + $0x58] sm:$0xff]  ;;  %v42_v20 = vld [vmem:[#allocation2 + $0x60] sm:$0xff]  ;;  %v49_v53 = vsub.s32 0, %v570_v52  ;;  %v145_v14 = vsub.s32 1, %v570_v52 }
  0x18   :  { %408 = vmatprep.subr.bf16.mxu0 %v515_v0  ;;  %v421_v19 = vpack.c.bf16 %v41_v18, %v40_v17  ;;  %v43_v21 = vld [vmem:[#allocation2 + $0x68] sm:$0xff]  ;;  %v44_v23 = vld [vmem:[#allocation2 + $0x70] sm:$0xff]  ;;  %v45_v24 = vld [vmem:[#allocation2 + $0x78] sm:$0xff]  ;;  %v150_v15 = vsub.s32 2, %v570_v52 }
  0x19   :  { %v424_v22 = vpack.c.bf16 %v43_v21, %v42_v20  ;;  %v427_v25 = vpack.c.bf16 %v45_v24, %v44_v23  ;;  %v29_v26 = vld [vmem:[%s593_s0] sm:$0xff]  ;;  %v158_v28 = vld [vmem:[#allocation2 + $0x88] sm:$0xff]  ;;  %v159_v30 = vld [vmem:[#allocation2 + $0x90] sm:$0xff] }
  0x1a   :  { %v157_v27 = vld [vmem:[#allocation2 + $0x80] sm:$0xff]  ;;  %v160_v31 = vld [vmem:[#allocation2 + $0x98] sm:$0xff]  ;;  %v162_v34 = vld [vmem:[#allocation2 + $0xa8] sm:$0xff] }
  0x1b   :  { %410 = vmatpush3.bf16.msra.mxu0 %v409_v7  ;;  %v430_v29 = vpack.c.bf16 %v158_v28, %v157_v27  ;;  %v433_v32 = vpack.c.bf16 %v160_v31, %v159_v30  ;;  %v161_v33 = vld [vmem:[#allocation2 + $0xa0] sm:$0xff]  ;;  %v163_v36 = vld [vmem:[#allocation2 + $0xb0] sm:$0xff]  ;;  %v164_v37 = vld [vmem:[#allocation2 + $0xb8] sm:$0xff] }
  0x1c   :  { %411 = vmatprep.subr.bf16.mxu0 %v515_v0  ;;  %v436_v35 = vpack.c.bf16 %v162_v34, %v161_v33  ;;  %v439_v38 = vpack.c.bf16 %v164_v37, %v163_v36  ;;  %v165_v39 = vld [vmem:[#allocation2 + $0xc0] sm:$0xff]  ;;  %v166_v40 = vld [vmem:[#allocation2 + $0xc8] sm:$0xff]  ;;  %v167_v42 = vld [vmem:[#allocation2 + $0xd0] sm:$0xff] }
  0x1d   :  { %431 = vmatpush3.bf16.msra.mxu1 %v430_v29  ;;  %v442_v41 = vpack.c.bf16 %v166_v40, %v165_v39  ;;  %v168_v43 = vld [vmem:[#allocation2 + $0xd8] sm:$0xff]  ;;  %v169_v45 = vld [vmem:[#allocation2 + $0xe0] sm:$0xff]  ;;  %v170_v46 = vld [vmem:[#allocation2 + $0xe8] sm:$0xff] }
  0x1e   :  { %432 = vmatprep.subr.bf16.mxu1 %v515_v0  ;;  %v445_v44 = vpack.c.bf16 %v168_v43, %v167_v42  ;;  %v448_v47 = vpack.c.bf16 %v170_v46, %v169_v45  ;;  %v171_v48 = vld [vmem:[#allocation2 + $0xf0] sm:$0xff]  ;;  %v172_v49 = vld [vmem:[#allocation2 + $0xf8] sm:$0xff]  ;;  %v46_v54 = vld [vmem:[%s595_s2] sm:$0x7] }
  0x1f   :  { %413 = vmatpush3.bf16.msra.mxu0 %v412_v10  ;;  %v451_v50 = vpack.c.bf16 %v172_v49, %v171_v48  ;;  %v50_v55 = vrot.slane %v46_v54, %v49_v53  ;;  %v146_v17 = vrot.slane %v46_v54, %v145_v14 }
  0x20   :  { %414 = vmatprep.subr.bf16.mxu0 %v515_v0 }
  0x21   :  { %434 = vmatpush3.bf16.msra.mxu1 %v433_v32 }
  0x22   :  { %435 = vmatprep.subr.bf16.mxu1 %v515_v0 }
  0x23   :  { %416 = vmatpush3.bf16.msra.mxu0 %v415_v13 }
  0x24   :  { %417 = vmatprep.subr.bf16.mxu0 %v515_v0 }
  0x25   :  { %437 = vmatpush3.bf16.msra.mxu1 %v436_v35 }
  0x26   :  { %438 = vmatprep.subr.bf16.mxu1 %v515_v0 }
  0x27   :  { %419 = vmatpush3.bf16.msra.mxu0 %v418_v16 }
  0x28   :  { %420 = vmatprep.subr.bf16.mxu0 %v515_v0 }
  0x29   :  { %440 = vmatpush3.bf16.msra.mxu1 %v439_v38 }
  0x2a   :  { %441 = vmatprep.subr.bf16.mxu1 %v515_v0 }
  0x2b   :  { %422 = vmatpush3.bf16.msra.mxu0 %v421_v19  ;;  %v151_v19 = vrot.slane %v46_v54, %v150_v15 }
  0x2c   :  { %423 = vmatprep.subr.bf16.mxu0 %v515_v0 }
  0x2d   :  { %443 = vmatpush3.bf16.msra.mxu1 %v442_v41 }
  0x2e   :  { %444 = vmatprep.subr.bf16.mxu1 %v515_v0 }
  0x2f   :  { %425 = vmatpush3.bf16.msra.mxu0 %v424_v22 }
  0x30   :  { %426 = vmatprep.subr.bf16.mxu0 %v515_v0 }
  0x31   :  { %446 = vmatpush3.bf16.msra.mxu1 %v445_v44 }
  0x32   :  { %447 = vmatprep.subr.bf16.mxu1 %v515_v0 }
  0x33   :  { %428 = vmatpush3.bf16.msra.mxu0 %v427_v25  ;;  %v300_v25 = vld [vmem:[%s595_s2 + $0x4] sm:$0x7]  ;;  %s518_s2 = smov [#allocation5]  }
  0x34   :  { %s291_s30 = sshll.u32 %s518_s2, 4  ;;  %s292_s30 = int_to_ptr.vmem [resolvable:$true] %s291_s30 }
  0x35   :  { %449 = vmatpush3.bf16.msra.mxu1 %v448_v47  ;;  %s486_s4 = scalar_lea.vmem %s292_s30, 128  ;;  %p491_p9 = scmp.lt.s32.totalorder %s292_s30, %s292_s30 }
  0x36   :  { %368 = vmatmul.mubr.f32.vlgmr.msra.gmra.mrb[0].mxu0 %v29_v26  ;;  %450 = vmatprep.subr.bf16.mxu1 %v515_v0  ;;  %v178_v26 = vrot.slane %v300_v25, %v49_v53  ;;  %v279_v53 = vrot.slane %v300_v25, %v150_v15  ;;  %p487_p8 = scmp.ne.s32.totalorder %s292_s30, %s486_s4  ;;  %p492_p10 = scmp.lt.s32.totalorder %s486_s4, %s486_s4 }
  0x38   :  { %p493_p11 = por %p492_p10, %p491_p9 }
  0x39   :  { %452 = vmatpush3.bf16.msra.mxu1 %v451_v50  ;;  %v274_v50 = vrot.slane %v300_v25, %v145_v14 }
  0x3a   :  { %p494_p12 = pnand %p493_p11, %p487_p8 }
 0x109   :  { %v117_v56 = vpop.f32.mrb[0].mxu0 }
 0x10a   :  { %v118_v57 = vadd.f32 %v117_v56, %v50_v55  ;;  %v369_v58 = vpop.f32.mrb[1].mxu0 }
 0x10c   :  { %v121_v59 = vrot.slane %v118_v57, 4  ;;  %v127_v60 = vmul.f32 %v118_v57, %v118_v57 }
 0x10e   :  { %v122_v61 = vadd.f32 %v121_v59, %v118_v57  ;;  %v128_v62 = vrot.slane %v127_v60, 4 }
 0x110   :  { %v123_v63 = vrot.slane %v122_v61, 2  ;;  %v129_v0 = vadd.f32 %v128_v62, %v127_v60 }
 0x112   :  { %v124_v1 = vadd.f32 %v123_v63, %v122_v61  ;;  %v130_v2 = vrot.slane %v129_v0, 2 }
 0x114   :  { %v125_v3 = vrot.slane %v124_v1, 1  ;;  %v131_v4 = vadd.f32 %v130_v2, %v129_v0 }
 0x116   :  { %v126_v5 = vadd.f32 %v125_v3, %v124_v1  ;;  %v132_v6 = vrot.slane %v131_v4, 1 }
 0x118   :  { %v133_v7 = vadd.f32 %v132_v6, %v131_v4  ;;  %v134_v8 = vmul.f32 0.125, %v126_v5 }
 0x11a   :  { %v135_v9 = vmul.f32 0.125, %v133_v7  ;;  %v136_v10 = vmul.f32 %v134_v8, %v134_v8  ;;  %v139_v16 = vsub.f32 %v118_v57, %v134_v8 }
 0x11c   :  { %v137_v11 = vsub.f32 %v135_v9, %v136_v10 }
 0x11e   :  { %v138_v12 = vmax.f32 %v137_v11, 0.0 }
 0x120   :  { %v140_v13 = vadd.f32 1e-05, %v138_v12 }
 0x122   :  { %460 = vrsqrt.f32 %v140_v13 }
 0x12c   :  { %v461_v18 = vpop.eup %460 }
 0x12d   :  { %v142_v20 = vmul.f32 %v461_v18, %v139_v16 }
 0x12f   :  { %v147_v21 = vmul.f32 %v146_v17, %v142_v20 }
 0x131   :  { %v152_v22 = vadd.f32 %v151_v19, %v147_v21 }
 0x133   :  { %vm153_vm1 = vcmp.ge.f32.partialorder %v152_v22, 0.0  ;;  %v154_v23 = vmul.f32 0.01, %v152_v22 }
 0x135   :  { %v155_v24 = vsel %vm153_vm1, %v152_v22, %v154_v23 }
 0x136   :  { %403 = vmatmul.mubr.f32.vlgmr.msra.gmra.mrb[0].mxu1 %v155_v24 }
 0x209   :  { %v245_v27 = vpop.f32.mrb[0].mxu1 }
 0x20a   :  { %v246_v28 = vadd.f32 %v245_v27, %v178_v26  ;;  %v404_v29 = vpop.f32.mrb[1].mxu1 }
 0x20c   :  { %v249_v30 = vrot.slane %v246_v28, 4  ;;  %v255_v31 = vmul.f32 %v246_v28, %v246_v28 }
 0x20e   :  { %v250_v32 = vadd.f32 %v249_v30, %v246_v28  ;;  %v256_v33 = vrot.slane %v255_v31, 4 }
 0x210   :  { %v251_v34 = vrot.slane %v250_v32, 2  ;;  %v257_v35 = vadd.f32 %v256_v33, %v255_v31 }
 0x212   :  { %v252_v36 = vadd.f32 %v251_v34, %v250_v32  ;;  %v258_v37 = vrot.slane %v257_v35, 2 }
 0x214   :  { %v253_v38 = vrot.slane %v252_v36, 1  ;;  %v259_v39 = vadd.f32 %v258_v37, %v257_v35 }
 0x216   :  { %v254_v40 = vadd.f32 %v253_v38, %v252_v36  ;;  %v260_v41 = vrot.slane %v259_v39, 1 }
 0x218   :  { %v261_v42 = vadd.f32 %v260_v41, %v259_v39  ;;  %v262_v43 = vmul.f32 0.125, %v254_v40 }
 0x21a   :  { %v263_v44 = vmul.f32 0.125, %v261_v42  ;;  %v264_v45 = vmul.f32 %v262_v43, %v262_v43  ;;  %v267_v49 = vsub.f32 %v246_v28, %v262_v43 }
 0x21c   :  { %v265_v46 = vsub.f32 %v263_v44, %v264_v45 }
 0x21e   :  { %v266_v47 = vmax.f32 %v265_v46, 0.0 }
 0x220   :  { %v268_v48 = vadd.f32 1e-05, %v266_v47 }
 0x222   :  { %462 = vrsqrt.f32 %v268_v48 }
 0x22c   :  { %v463_v51 = vpop.eup %462 }
 0x22d   :  { %v270_v52 = vmul.f32 %v463_v51, %v267_v49 }
 0x22f   :  { %v275_v54 = vmul.f32 %v274_v50, %v270_v52 }
 0x231   :  { %v280_v55 = vadd.f32 %v279_v53, %v275_v54 }
 0x233   :  { %vm281_vm2 = vcmp.ge.f32.partialorder %v280_v55, 0.0  ;;  %v282_v56 = vmul.f32 0.01, %v280_v55 }
 0x235   :  { %v283_v57 = vsel %vm281_vm2, %v280_v55, %v282_v56 }
 0x236   :  { %284 = vst [vmem:[#allocation5] sm:$0xff] %v283_v57 }
 0x237   :  { %497 = shalt.err (!%p494_p12)
}
 0x238   :  { %s498_s7 = scalar_lea.hbm %s596_s3, 128 }
 0x239   :  { %p499_p13 = scmp.ne.s32.totalorder %s596_s3, %s498_s7  ;;  %p502_p0 = scmp.lt.u32.totalorder %s498_s7, %s596_s3 }
 0x23b   :  { %p504_p1 = pnand %p502_p0, %p499_p13 }
 0x23d   :  { %507 = shalt.err (!%p504_p1)
}
 0x23e   :  { %294 = dma.vmem_to_hbm [thread:$0]  %s292_s30, 128, %s596_s3, [#allocation4]  }
 0x23f   :  { %510 = dma.done.wait [#allocation4], 128  }
 0x240   :  { %511 = vsyncadd [#allocation4], 4294967168 }
 0x241   :  { %298 = vsyncpa [#allocation3], 1 }
 0x242   :  { %299 = vsyncpa [#allocation4], 1 }

</bundles_post_ra>
